<compile_context>
chip_gen: v6e
topology: v6e:2x2x1
jax: 0.10.0
libtpu: 0.0.40
codegen_flags: <defaults>
</compile_context>

<pallas_src>
import math
import functools

import jax
import jax.numpy as jnp
from jax import lax
from jax.experimental import pallas as pl
from jax.experimental.pallas import tpu as pltpu

N = 12
M = N * (N - 1) // 2     # 66
DEFAULT_TB = 2048        # batch tile on the lane axis (multiple of 128)


def _round_up(x, m):
    return ((x + m - 1) // m) * m


def _pick_batch_tile(B, tb):
    """Clamp the requested tile to the batch, keep it a multiple of 128, and
    prefer a grid of >= 2 steps so the 'parallel' axis can use both v7x TCs."""
    full = _round_up(B, 128)
    t = max(128, (min(tb, full) // 128) * 128)
    if pl.cdiv(B, t) < 2 and full >= 256:
        t = max(128, _round_up(full // 2, 128))
    return t


def _mlp_kernel(n_hidden, s_ref, m_ref, *refs):
    # refs layout: ws, wm, b0, (w_i, b_i) * n_hidden, wf, bf, out_ref
    it = iter(refs)
    ws_ref = next(it)     # (H0, M)
    wm_ref = next(it)     # (H0, M)
    b0_ref = next(it)     # (H0, 1)
    hidden = [(next(it), next(it)) for _ in range(n_hidden)]
    wf_ref = next(it)     # (Hlast, 1)
    bf_ref = next(it)     # (1, 1)
    out_ref = next(it)    # (1, TB)

    # First layer: contract the feature axis of the natural-layout (TB, M)
    # tiles directly (transposed-rhs dot): (H0, M) . (TB, M)^T -> (H0, TB).
    # Batch lives on the lane axis from here on (lane-dense activations).
    dn = (((1,), (1,)), ((), ()))
    x = lax.dot_general(ws_ref[...], s_ref[...], dn,
                        preferred_element_type=jnp.float32)
    x = x + lax.dot_general(wm_ref[...], m_ref[...], dn,
                            preferred_element_type=jnp.float32)
    x = jnp.maximum(x + b0_ref[...], 0.0)

    # Hidden layers: (H, H) @ (H, TB) -> (H, TB)
    for w_ref, b_ref in hidden:
        x = jnp.dot(w_ref[...], x, preferred_element_type=jnp.float32)
        x = jnp.maximum(x + b_ref[...], 0.0)

    # Final H -> 1 layer: VPU multiply + sublane reduce (avoids M=1 MXU push).
    logits = jnp.sum(x * wf_ref[...], axis=0, keepdims=True) + bf_ref[...]
    out_ref[...] = jax.nn.sigmoid(logits).astype(out_ref.dtype)   # (1, TB)


def mymodel_forward(state, move, params, *, tb=DEFAULT_TB):
    """state, move: (B, M) arrays (float32 or bfloat16; bf16 halves the HBM
    read of the dominant input stream).  params: PyTorch-convention weights
    (out, in) and biases (out,), float32."""
    assert state.shape == move.shape and state.shape[1] == M
    assert state.dtype == move.dtype
    B = state.shape[0]
    n_hidden = len(params["layers"])
    in_dtype = state.dtype

    t = _pick_batch_tile(B, tb)
    grid = (pl.cdiv(B, t),)

    # First-layer weights streamed at the activation dtype (bf16 x bf16 with
    # f32 accumulate is native on the MXU); everything else stays f32.
    weight_inputs = [
        params["ws"].astype(in_dtype),                       # (H0, M)
        params["wm"].astype(in_dtype),                       # (H0, M)
        params["bs"].reshape(-1, 1).astype(jnp.float32),     # (H0, 1)
    ]
    for w, b in params["layers"]:
        weight_inputs += [w.astype(jnp.float32),
                          b.reshape(-1, 1).astype(jnp.float32)]
    weight_inputs += [
        params["wf"].reshape(-1, 1).astype(jnp.float32),     # (Hlast, 1)
        params["bf"].reshape(1, 1).astype(jnp.float32),      # (1, 1)
    ]

    # Streaming activation tiles march along the batch axis; the last block
    # may be partial (no wrapper-side padding).  OOB-read garbage only feeds
    # OOB batch lanes, which the masked output store discards.  Weight/bias
    # blocks are pinned at (0, 0) -> stay VMEM-resident across the grid.
    in_specs = [
        pl.BlockSpec((t, M), lambda i: (i, 0)),   # state tile
        pl.BlockSpec((t, M), lambda i: (i, 0)),   # move tile
    ] + [pl.BlockSpec(a.shape, lambda i: (0, 0)) for a in weight_inputs]
    out_spec = pl.BlockSpec((1, t), lambda i: (0, i))        # lane-dense out

    # Only raise scoped VMEM when the double-buffered streaming tiles would
    # approach v5e's 16 MiB default; cap well below v7x's 64 MiB physical.
    stream_bytes = 2 * 2 * t * M * jnp.dtype(in_dtype).itemsize
    cp_kwargs = dict(dimension_semantics=("parallel",))
    if stream_bytes > (12 << 20):
        cp_kwargs["vmem_limit_bytes"] = min(
            int(1.5 * stream_bytes) + (4 << 20), 48 << 20)

    kernel = functools.partial(_mlp_kernel, n_hidden)

    out = pl.pallas_call(
        kernel,
        out_shape=jax.ShapeDtypeStruct((1, B), jnp.float32),
        grid=grid,
        in_specs=in_specs,
        out_specs=out_spec,
        compiler_params=pltpu.CompilerParams(**cp_kwargs),
    )(state, move, *weight_inputs)

    return out.reshape(B, 1)


def init_params(key, layer_dims):
    """PyTorch-style init: weight (out, in), bias (out,), uniform +-1/sqrt(fan_in)."""
    def linear(key, fan_in, fan_out, bias=True):
        kw, kb = jax.random.split(key)
        bound = 1.0 / math.sqrt(fan_in)
        w = jax.random.uniform(kw, (fan_out, fan_in), jnp.float32, -bound, bound)
        if bias:
            b = jax.random.uniform(kb, (fan_out,), jnp.float32, -bound, bound)
            return w, b
        return w, None

    keys = jax.random.split(key, 3 + len(layer_dims))
    ws, bs = linear(keys[0], M, layer_dims[0], bias=True)
    wm, _ = linear(keys[1], M, layer_dims[0], bias=False)
    layers = []
    for i, (a, b_dim) in enumerate(zip(layer_dims, layer_dims[1:])):
        w, b = linear(keys[2 + i], a, b_dim, bias=True)
        layers.append((w, b))
    wf, bf = linear(keys[-1], layer_dims[-1], 1, bias=True)
    return {"ws": ws, "bs": bs, "wm": wm, "layers": layers, "wf": wf, "bf": bf}


def reference_forward(state, move, params):
    """Pure-JAX reference matching the PyTorch module."""
    x = state @ params["ws"].T + params["bs"] + move @ params["wm"].T
    x = jnp.maximum(x, 0.0)
    for w, b in params["layers"]:
        x = jnp.maximum(x @ w.T + b, 0.0)
    return jax.nn.sigmoid(x @ params["wf"].T + params["bf"])


if __name__ == "__main__":
    layer_dims = [32, 32]   # first hidden width 32, one hidden layer 32 -> 32
    B = 300                 # not a multiple of 128 -> exercises partial blocks

    key = jax.random.PRNGKey(0)
    k_state, k_move, k_params = jax.random.split(key, 3)

    state = jax.random.normal(k_state, (B, M), jnp.float32)
    move = jax.random.normal(k_move, (B, M), jnp.float32)
    params = init_params(k_params, layer_dims)

    ref = reference_forward(state, move, params)

    # f32 path with the default tile heuristic (2 grid steps, partial last block)
    out = jax.block_until_ready(mymodel_forward(state, move, params))
    assert out.shape == (B, 1), out.shape
    assert jnp.allclose(out, ref, atol=2e-5, rtol=1e-4), (
        float(jnp.max(jnp.abs(out - ref))))

    # small explicit tile -> longer grid with a partial last block
    out_small = jax.block_until_ready(
        mymodel_forward(state, move, params, tb=128))
    assert jnp.allclose(out_small, ref, atol=2e-5, rtol=1e-4), (
        float(jnp.max(jnp.abs(out_small - ref))))

    # bf16 streaming path (halves the dominant HBM read; f32 accumulation)
    state_bf = state.astype(jnp.bfloat16)
    move_bf = move.astype(jnp.bfloat16)
    out_bf = jax.block_until_ready(mymodel_forward(state_bf, move_bf, params))
    ref_bf = reference_forward(state_bf.astype(jnp.float32),
                               move_bf.astype(jnp.float32), params)
    assert jnp.allclose(out_bf, ref_bf, atol=5e-2), (
        float(jnp.max(jnp.abs(out_bf - ref_bf))))

    print("KERNEL_OK")
</pallas_src>

<mosaic_0001>
module attributes {stable_mosaic.version = 11 : i64} {
  func.func @_mlp_kernel(%arg0: i32, %arg1: memref<256x66xf32, #tpu.memory_space<vmem>>, %arg2: memref<256x66xf32, #tpu.memory_space<vmem>>, %arg3: memref<32x66xf32, #tpu.memory_space<vmem>>, %arg4: memref<32x66xf32, #tpu.memory_space<vmem>>, %arg5: memref<32x1xf32, #tpu.memory_space<vmem>>, %arg6: memref<32x32xf32, #tpu.memory_space<vmem>>, %arg7: memref<32x1xf32, #tpu.memory_space<vmem>>, %arg8: memref<32x1xf32, #tpu.memory_space<vmem>>, %arg9: memref<1x1xf32, #tpu.memory_space<vmem>>, %arg10: memref<1x256xf32, #tpu.memory_space<vmem>>) attributes {dimension_semantics = [#tpu.dimension_semantics<parallel>], iteration_bounds = array<i64: 2>, scalar_prefetch = 0 : i64, scratch_operands = 0 : i64, tpu.core_type = #tpu.core_type<tc>, window_params = [{transform_indices = @transform_0, window_bounds = array<i64: 256, 66>}, {transform_indices = @transform_1, window_bounds = array<i64: 256, 66>}, {pipeline_mode = #tpu.pipeline_mode<synchronous>, transform_indices = @transform_2, window_bounds = array<i64: 32, 66>}, {pipeline_mode = #tpu.pipeline_mode<synchronous>, transform_indices = @transform_3, window_bounds = array<i64: 32, 66>}, {pipeline_mode = #tpu.pipeline_mode<synchronous>, transform_indices = @transform_4, window_bounds = array<i64: 32, 1>}, {pipeline_mode = #tpu.pipeline_mode<synchronous>, transform_indices = @transform_5, window_bounds = array<i64: 32, 32>}, {pipeline_mode = #tpu.pipeline_mode<synchronous>, transform_indices = @transform_6, window_bounds = array<i64: 32, 1>}, {pipeline_mode = #tpu.pipeline_mode<synchronous>, transform_indices = @transform_7, window_bounds = array<i64: 32, 1>}, {pipeline_mode = #tpu.pipeline_mode<synchronous>, transform_indices = @transform_8, window_bounds = array<i64: 1, 1>}, {transform_indices = @transform_9, window_bounds = array<i64: 1, 256>}]} {
    %c0 = arith.constant 0 : index
    %c0_0 = arith.constant 0 : index
    %0 = vector.load %arg3[%c0, %c0_0] : memref<32x66xf32, #tpu.memory_space<vmem>>, vector<32x66xf32>
    %c0_1 = arith.constant 0 : index
    %c0_2 = arith.constant 0 : index
    %1 = vector.load %arg1[%c0_1, %c0_2] : memref<256x66xf32, #tpu.memory_space<vmem>>, vector<256x66xf32>
    %cst = arith.constant dense<0.000000e+00> : vector<32x256xf32>
    %2 = tpu.matmul %0, %1, %cst {dimension_numbers = #tpu.dot_dimension_numbers<[1], [1], [0], [0], [0, 0, 1, 0], [], []>} : vector<32x66xf32>, vector<256x66xf32>, vector<32x256xf32> -> vector<32x256xf32>
    %c0_3 = arith.constant 0 : index
    %c0_4 = arith.constant 0 : index
    %3 = vector.load %arg4[%c0_3, %c0_4] : memref<32x66xf32, #tpu.memory_space<vmem>>, vector<32x66xf32>
    %c0_5 = arith.constant 0 : index
    %c0_6 = arith.constant 0 : index
    %4 = vector.load %arg2[%c0_5, %c0_6] : memref<256x66xf32, #tpu.memory_space<vmem>>, vector<256x66xf32>
    %cst_7 = arith.constant dense<0.000000e+00> : vector<32x256xf32>
    %5 = tpu.matmul %3, %4, %cst_7 {dimension_numbers = #tpu.dot_dimension_numbers<[1], [1], [0], [0], [0, 0, 1, 0], [], []>} : vector<32x66xf32>, vector<256x66xf32>, vector<32x256xf32> -> vector<32x256xf32>
    %6 = arith.addf %2, %5 : vector<32x256xf32>
    %c0_8 = arith.constant 0 : index
    %c0_9 = arith.constant 0 : index
    %7 = vector.load %arg5[%c0_8, %c0_9] : memref<32x1xf32, #tpu.memory_space<vmem>>, vector<32x1xf32>
    %8 = vector.broadcast %7 : vector<32x1xf32> to vector<32x256xf32>
    %9 = arith.addf %6, %8 : vector<32x256xf32>
    %cst_10 = arith.constant 0.000000e+00 : f32
    %10 = vector.broadcast %cst_10 : f32 to vector<32x256xf32>
    %11 = arith.maximumf %9, %10 : vector<32x256xf32>
    %c0_11 = arith.constant 0 : index
    %c0_12 = arith.constant 0 : index
    %12 = vector.load %arg6[%c0_11, %c0_12] : memref<32x32xf32, #tpu.memory_space<vmem>>, vector<32x32xf32>
    %cst_13 = arith.constant dense<0.000000e+00> : vector<32x256xf32>
    %13 = tpu.matmul %12, %11, %cst_13 {dimension_numbers = #tpu.dot_dimension_numbers<[1], [0], [0], [1], [0, 0, 1, 1], [], []>} : vector<32x32xf32>, vector<32x256xf32>, vector<32x256xf32> -> vector<32x256xf32>
    %c0_14 = arith.constant 0 : index
    %c0_15 = arith.constant 0 : index
    %14 = vector.load %arg7[%c0_14, %c0_15] : memref<32x1xf32, #tpu.memory_space<vmem>>, vector<32x1xf32>
    %15 = vector.broadcast %14 : vector<32x1xf32> to vector<32x256xf32>
    %16 = arith.addf %13, %15 : vector<32x256xf32>
    %cst_16 = arith.constant 0.000000e+00 : f32
    %17 = vector.broadcast %cst_16 : f32 to vector<32x256xf32>
    %18 = arith.maximumf %16, %17 : vector<32x256xf32>
    %c0_17 = arith.constant 0 : index
    %c0_18 = arith.constant 0 : index
    %19 = vector.load %arg8[%c0_17, %c0_18] : memref<32x1xf32, #tpu.memory_space<vmem>>, vector<32x1xf32>
    %20 = vector.broadcast %19 : vector<32x1xf32> to vector<32x256xf32>
    %21 = arith.mulf %18, %20 : vector<32x256xf32>
    %cst_19 = arith.constant dense<0.000000e+00> : vector<256xf32>
    %22 = vector.multi_reduction <add>, %21, %cst_19 [0] : vector<32x256xf32> to vector<256xf32>
    %23 = vector.shape_cast %22 : vector<256xf32> to vector<1x256xf32>
    %c0_20 = arith.constant 0 : index
    %c0_21 = arith.constant 0 : index
    %24 = vector.load %arg9[%c0_20, %c0_21] : memref<1x1xf32, #tpu.memory_space<vmem>>, vector<1x1xf32>
    %25 = vector.broadcast %24 : vector<1x1xf32> to vector<1x256xf32>
    %26 = arith.addf %23, %25 : vector<1x256xf32>
    %27 = arith.negf %26 : vector<1x256xf32>
    %28 = math.exp %27 : vector<1x256xf32>
    %cst_22 = arith.constant 1.000000e+00 : f32
    %29 = vector.broadcast %cst_22 : f32 to vector<1x256xf32>
    %30 = arith.addf %29, %28 : vector<1x256xf32>
    %31 = arith.divf %29, %30 : vector<1x256xf32>
    %c0_23 = arith.constant 0 : index
    %c0_24 = arith.constant 0 : index
    %32 = vector.load %arg10[%c0_23, %c0_24] : memref<1x256xf32, #tpu.memory_space<vmem>>, vector<1x256xf32>
    tpu.vector_store %arg10[%c0_23, %c0_24], %31 {strides = array<i32>} : memref<1x256xf32, #tpu.memory_space<vmem>>, vector<1x256xf32>,
    return
  }
  func.func @transform_0(%arg0: i32) -> (i32, i32) {
    %c0_i32 = arith.constant 0 : i32
    %c0_i32_0 = arith.constant 0 : i32
    return %arg0, %c0_i32 : i32, i32
  }
  func.func @transform_1(%arg0: i32) -> (i32, i32) {
    %c0_i32 = arith.constant 0 : i32
    %c0_i32_0 = arith.constant 0 : i32
    return %arg0, %c0_i32 : i32, i32
  }
  func.func @transform_2(%arg0: i32) -> (i32, i32) {
    %c0_i32 = arith.constant 0 : i32
    %c0_i32_0 = arith.constant 0 : i32
    %c0_i32_1 = arith.constant 0 : i32
    return %c0_i32, %c0_i32_0 : i32, i32
  }
  func.func @transform_3(%arg0: i32) -> (i32, i32) {
    %c0_i32 = arith.constant 0 : i32
    %c0_i32_0 = arith.constant 0 : i32
    %c0_i32_1 = arith.constant 0 : i32
    return %c0_i32, %c0_i32_0 : i32, i32
  }
  func.func @transform_4(%arg0: i32) -> (i32, i32) {
    %c0_i32 = arith.constant 0 : i32
    %c0_i32_0 = arith.constant 0 : i32
    %c0_i32_1 = arith.constant 0 : i32
    return %c0_i32, %c0_i32_0 : i32, i32
  }
  func.func @transform_5(%arg0: i32) -> (i32, i32) {
    %c0_i32 = arith.constant 0 : i32
    %c0_i32_0 = arith.constant 0 : i32
    %c0_i32_1 = arith.constant 0 : i32
    return %c0_i32, %c0_i32_0 : i32, i32
  }
  func.func @transform_6(%arg0: i32) -> (i32, i32) {
    %c0_i32 = arith.constant 0 : i32
    %c0_i32_0 = arith.constant 0 : i32
    %c0_i32_1 = arith.constant 0 : i32
    return %c0_i32, %c0_i32_0 : i32, i32
  }
  func.func @transform_7(%arg0: i32) -> (i32, i32) {
    %c0_i32 = arith.constant 0 : i32
    %c0_i32_0 = arith.constant 0 : i32
    %c0_i32_1 = arith.constant 0 : i32
    return %c0_i32, %c0_i32_0 : i32, i32
  }
  func.func @transform_8(%arg0: i32) -> (i32, i32) {
    %c0_i32 = arith.constant 0 : i32
    %c0_i32_0 = arith.constant 0 : i32
    %c0_i32_1 = arith.constant 0 : i32
    return %c0_i32, %c0_i32_0 : i32, i32
  }
  func.func @transform_9(%arg0: i32) -> (i32, i32) {
    %c0_i32 = arith.constant 0 : i32
    %c0_i32_0 = arith.constant 0 : i32
    return %c0_i32, %arg0 : i32, i32
  }
}

</mosaic_0001>

<bundles_post_ra>
// kernel: tpu_custom_call.1
= control target key start
LH: loop header
LB: loop body
LE: loop exit
PB: predicated region body
PF: predicated region fallthrough
CT: control target
= control target key end

     0   :  { %s1931_s0 = inlined_call_operand.vmem [shape: f32[300,66], index: 0, kind: input, shape index: {}]   ;;  %s1932_s1 = inlined_call_operand.vmem [shape: f32[300,66], index: 1, kind: input, shape index: {}]   ;;  %s1933_s2 = inlined_call_operand.vmem [shape: f32[32,66], index: 2, kind: input, shape index: {}]   ;;  %s1934_s3 = inlined_call_operand.vmem [shape: f32[32,66], index: 3, kind: input, shape index: {}]   ;;  %s1935_s4 = inlined_call_operand.vmem [shape: f32[32,1], index: 4, kind: input, shape index: {}]   ;;  %s1936_s5 = inlined_call_operand.vmem [shape: f32[32,32], index: 5, kind: input, shape index: {}]   ;;  %s1937_s6 = inlined_call_operand.vmem [shape: f32[32,1], index: 6, kind: input, shape index: {}]   ;;  %s1938_s7 = inlined_call_operand.vmem [shape: f32[32,1], index: 7, kind: input, shape index: {}]   ;;  %s1939_s8 = inlined_call_operand.<no memory space> [shape: f32[1,1], index: 8, kind: input, shape index: {}]   ;;  %s1940_s9 = inlined_call_operand.hbm [shape: f32[1,300], index: 9, kind: output, shape index: {}]  }
   0x1   :  { %v14_v0 = vstv %s1939_s8 }
   0x2   :  { %15 = vst [vmem:[#allocation2] sm:$0x1] %v14_v0 }
   0x3   :  { %16 = vsyncpa [#allocation4], 0 }
   0x4   :  { %18 = vsyncpa [#allocation4 + $0x1], 0  ;;  %s1588_s11 = smov 0   ;;  %s1590_s12 = smov 0  }
   0x5   :  { %s1592_s13 = smov 0   ;;  %s1594_s14 = smov 0  }
   0x6 LB: > { %s1609_s8 = sadd.s32 4294967295, %s1529_s14   ;;  %s1235_s15 = sadd.s32 4294967294, %s1529_s14   ;;  %s1529_s14 = sphi %s1594_s14, %s1946_s14   ;;  %s1525_s13 = sphi %s1592_s13, %s1945_s13   ;;  %s1521_s12 = sphi %s1590_s12, %s1944_s12   ;;  %s1517_s11 = sphi %s1588_s11, %s1943_s11  }
   0x7   : > { %s1613_s16 = sadd.s32 1, %s1529_s14   ;;  %s230_s17 = sadd.s32 1, %s1525_s13 }
   0x8   : > { %s227_s18 = ssub.s32 %s1529_s14, %s1613_s16  ;;  %p240_p0 = scmp.ne.s32.totalorder %s1525_s13, %s1521_s12 }
   0x9   : > { %p228_p1 = scmp.eq.s32.totalorder %s227_s18, 0  ;;  %p241_p2 = scmp.eq.s32.totalorder %s1609_s8, 1 }
   0xa   : > { %p246_p3 = scmp.ne.s32.totalorder %s1521_s12, %s1517_s11  ;;  %p247_p4 = scmp.eq.s32.totalorder %s1235_s15, 1 }
   0xb   : > { %s1624_s19 = scalar_select %p228_p1, %s1525_s13, %s230_s17  }
   0xc   : > { %p1626_p5 = por %p241_p2, %p240_p0  ;;  %p1630_p6 = por %p247_p4, %p246_p3 }
   0xd   : > { %p1238_p7 = scmp.ge.s32.totalorder %s1529_s14, 1  ;;  %p320_p8 = scmp.lt.s32.totalorder %s1529_s14, 3 }
   0xf   : > { %p321_p9 = pnand %p1238_p7, %p320_p8 }
  0x10   : > { %s1637_s22 = sshll.u32 (!%p321_p9), %s1609_s8, 5  ;;  %s366_s17 = sand.u32 (!%p321_p9), 1, %s1521_s12  }
  0x11   : > { %324 = sbr.rel (%p321_p9) target bundleno = 604 (0x25c), region = 56  ;;  %p374_p10 = scmp.lt.s32.totalorder (!%p321_p9), %s1637_s22, 37 }
  0x12   : > { %s1884_s24 = scalar_lea.sflag (!%p321_p9), [#allocation4], %s366_s17 }
  0x16   : > { %vm474_vm0 = vcmask 539648   ;;  %v1642_v1 = vld [vmem:[%s1934_s3] sm:$0xff]  ;;  %v1531_v3 = vmov 0   ;;  %v872_v4 = vld [vmem:[%s1935_s4 + $0x18] sm:$0xff]  ;;  %s375_s29 = scalar_select %p374_p10, %s1637_s22, 37  ;;  %v870_v5 = vld [vmem:[%s1935_s4 + $0x8] sm:$0xff] }
  0x17   : > { %v1647_v2 = vld [vmem:[%s1933_s2] sm:$0xff]  ;;  %1362 = vmatprep.mubr.msk.f32.mxu0 %vm474_vm0, %v1642_v1  ;;  %1459 = vset.pattern.permute.xlu0 %v1531_v3  ;;  %v871_v6 = vld [vmem:[%s1935_s4 + $0x10] sm:$0xff]  ;;  %v914_v20 = vld [vmem:[%s1937_s6 + $0x8] sm:$0xff]  ;;  %vm937_vm1 = vcmask 261120   ;;  %s1323_s26 = sshll.u32 (%p1626_p5), %s1609_s8, 1 }
  0x18   : > { %1402 = vmatprep.mubr.msk.f32.mxu1 %vm474_vm0, %v1647_v2  ;;  %1460 = vset.pattern.permute.xlu1 %v1531_v3  ;;  %s1241_s18 = sshll.u32 %s375_s29, 3  ;;  %v913_v7 = vld [vmem:[%s1937_s6] sm:$0xff]  ;;  %v915_v19 = vld [vmem:[%s1937_s6 + $0x10] sm:$0xff]  ;;  %v916_v26 = vld [vmem:[%s1937_s6 + $0x18] sm:$0xff]  ;;  %s1153_s27 = ssub.s32 (%p1626_p5), 3, %s1323_s26 }
  0x19   : > { %890 = vperm.xlu0 %1459, %v872_v4   ;;  %880 = vperm.xlu1 %1460, %v870_v5   ;;  %s1667_s25 = scalar_lea.vmem %s1932_s1, %s1241_s18  ;;  %s1672_s28 = scalar_lea.vmem %s1931_s0, %s1241_s18  ;;  %v869_v8 = vld [vmem:[%s1935_s4] sm:$0xff]  ;;  %v1049_v31 = vld [vmem:[%s1938_s7 + $0x10] sm:$0xff]  ;;  %v1048_v32 = vld [vmem:[%s1938_s7 + $0x8] sm:$0xff] }
  0x1a   : > { %v473_v9 = vld [vmem:[%s1667_s25 + $0xf8] sm:$0xff]  ;;  %v472_v13 = vld [vmem:[%s1667_s25 + $0xf0] sm:$0xff]  ;;  %v471_v17 = vld [vmem:[%s1667_s25 + $0xe8] sm:$0xff]  ;;  %s1239_s18 = sshll.u32 %s366_s17, 1  ;;  %p1154_p11 = scmp.lt.s32.totalorder (%p1626_p5), %s1153_s27, 2 }
  0x1b   : > { %v437_v10 = vld [vmem:[%s1672_s28 + $0xf8] sm:$0xff]  ;;  %1330 = vmatprep.subr.msk.mxu0 %vm474_vm0, %v473_v9  ;;  %v436_v14 = vld [vmem:[%s1672_s28 + $0xf0] sm:$0xff]  ;;  %v435_v18 = vld [vmem:[%s1672_s28 + $0xe8] sm:$0xff]  ;;  %s368_s23 = scalar_lea.vmem [#allocation3], %s1239_s18 }
  0x1c   : > { %v457_v11 = vld [vmem:[%s1667_s25 + $0x78] sm:$0xff]  ;;  %1370 = vmatprep.subr.msk.mxu1 %vm474_vm0, %v437_v10  ;;  %v456_v15 = vld [vmem:[%s1667_s25 + $0x70] sm:$0xff]  ;;  %v455_v21 = vld [vmem:[%s1667_s25 + $0x68] sm:$0xff] }
  0x1d   : > { %885 = vperm.xlu0 %1459, %v871_v6   ;;  %v421_v12 = vld [vmem:[%s1672_s28 + $0x78] sm:$0xff]  ;;  %1331 = vmatpush3.xpose.msk.msra.mxu0 %vm474_vm0, %v457_v11  ;;  %v420_v16 = vld [vmem:[%s1672_s28 + $0x70] sm:$0xff]  ;;  %v419_v22 = vld [vmem:[%s1672_s28 + $0x68] sm:$0xff] }
  0x1e   : > { %1371 = vmatpush3.xpose.msk.msra.mxu1 %vm474_vm0, %v421_v12  ;;  %1332 = vmatprep.subr.msk.mxu0 %vm474_vm0, %v472_v13  ;;  %v470_v23 = vld [vmem:[%s1667_s25 + $0xe0] sm:$0xff]  ;;  %v469_v29 = vld [vmem:[%s1667_s25 + $0xd8] sm:$0xff]  ;;  %v468_v35 = vld [vmem:[%s1667_s25 + $0xd0] sm:$0xff] }
  0x1f   : > { %1372 = vmatprep.subr.msk.mxu1 %vm474_vm0, %v436_v14  ;;  %875 = vperm.xlu1 %1460, %v869_v8   ;;  %v434_v24 = vld [vmem:[%s1672_s28 + $0xe0] sm:$0xff]  ;;  %v433_v30 = vld [vmem:[%s1672_s28 + $0xd8] sm:$0xff]  ;;  %v432_v36 = vld [vmem:[%s1672_s28 + $0xd0] sm:$0xff] }
  0x20   : > { %v1047_v25 = vld [vmem:[%s1938_s7] sm:$0xff]  ;;  %v453_v33 = vld [vmem:[%s1667_s25 + $0x58] sm:$0xff]  ;;  %v452_v39 = vld [vmem:[%s1667_s25 + $0x50] sm:$0xff] }
  0x21   : > { %919 = vperm.xlu0 %1459, %v913_v7   ;;  %1333 = vmatpush3.xpose.msk.msra.mxu0 %vm474_vm0, %v456_v15  ;;  %v454_v27 = vld [vmem:[%s1667_s25 + $0x60] sm:$0xff]  ;;  %v417_v34 = vld [vmem:[%s1672_s28 + $0x58] sm:$0xff]  ;;  %v416_v40 = vld [vmem:[%s1672_s28 + $0x50] sm:$0xff] }
  0x22   : > { %1373 = vmatpush3.xpose.msk.msra.mxu1 %vm474_vm0, %v420_v16  ;;  %1334 = vmatprep.subr.msk.mxu0 %vm474_vm0, %v471_v17  ;;  %v418_v28 = vld [vmem:[%s1672_s28 + $0x60] sm:$0xff]  ;;  %v1050_v38 = vld [vmem:[%s1938_s7 + $0x18] sm:$0xff]  ;;  %v467_v41 = vld [vmem:[%s1667_s25 + $0xc8] sm:$0xff] }
  0x23   : > { %1374 = vmatprep.subr.msk.mxu1 %vm474_vm0, %v435_v18  ;;  %924 = vperm.xlu1 %1460, %v914_v20   ;;  %v1097_v37 = vld [vmem:[#allocation2] sm:$0x1]  ;;  %v431_v42 = vld [vmem:[%s1672_s28 + $0xc8] sm:$0xff]  ;;  %v465_v49 = vld [vmem:[%s1667_s25 + $0xb8] sm:$0xff] }
  0x24   : > { %v451_v43 = vld [vmem:[%s1667_s25 + $0x48] sm:$0xff]  ;;  %v466_v45 = vld [vmem:[%s1667_s25 + $0xc0] sm:$0xff]  ;;  %v429_v50 = vld [vmem:[%s1672_s28 + $0xb8] sm:$0xff] }
  0x25   : > { %929 = vperm.xlu0 %1459, %v915_v19   ;;  %1335 = vmatpush3.xpose.msk.msra.mxu0 %vm474_vm0, %v455_v21  ;;  %v415_v44 = vld [vmem:[%s1672_s28 + $0x48] sm:$0xff]  ;;  %v430_v46 = vld [vmem:[%s1672_s28 + $0xc0] sm:$0xff]  ;;  %v449_v51 = vld [vmem:[%s1667_s25 + $0x38] sm:$0xff] }
  0x26   : > { %1375 = vmatpush3.xpose.msk.msra.mxu1 %vm474_vm0, %v419_v22  ;;  %1336 = vmatprep.subr.msk.mxu0 %vm474_vm0, %v470_v23  ;;  %v450_v47 = vld [vmem:[%s1667_s25 + $0x40] sm:$0xff]  ;;  %v413_v52 = vld [vmem:[%s1672_s28 + $0x38] sm:$0xff]  ;;  %v464_v53 = vld [vmem:[%s1667_s25 + $0xb0] sm:$0xff]  ;;  %v1532_v23 = vmov 0.0  }
  0x27   : > { %1376 = vmatprep.subr.msk.mxu1 %vm474_vm0, %v434_v24  ;;  %934 = vperm.xlu1 %1460, %v916_v26   ;;  %v414_v48 = vld [vmem:[%s1672_s28 + $0x40] sm:$0xff]  ;;  %v428_v54 = vld [vmem:[%s1672_s28 + $0xb0] sm:$0xff]  ;;  %v463_v57 = vld [vmem:[%s1667_s25 + $0xa8] sm:$0xff] }
  0x28   : > { %v448_v55 = vld [vmem:[%s1667_s25 + $0x30] sm:$0xff]  ;;  %v427_v58 = vld [vmem:[%s1672_s28 + $0xa8] sm:$0xff]  ;;  %v462_v61 = vld [vmem:[%s1667_s25 + $0xa0] sm:$0xff] }
  0x29   : > { %1053 = vperm.xlu0 %1459, %v1047_v25   ;;  %1337 = vmatpush3.xpose.msk.msra.mxu0 %vm474_vm0, %v454_v27  ;;  %v412_v56 = vld [vmem:[%s1672_s28 + $0x30] sm:$0xff]  ;;  %v447_v59 = vld [vmem:[%s1667_s25 + $0x28] sm:$0xff]  ;;  %v426_v62 = vld [vmem:[%s1672_s28 + $0xa0] sm:$0xff] }
  0x2a   : > { %1377 = vmatpush3.xpose.msk.msra.mxu1 %vm474_vm0, %v418_v28  ;;  %1338 = vmatprep.subr.msk.mxu0 %vm474_vm0, %v469_v29  ;;  %v411_v60 = vld [vmem:[%s1672_s28 + $0x28] sm:$0xff]  ;;  %v446_v63 = vld [vmem:[%s1667_s25 + $0x20] sm:$0xff]  ;;  %v461_v3 = vld [vmem:[%s1667_s25 + $0x98] sm:$0xff] }
  0x2b   : > { %1378 = vmatprep.subr.msk.mxu1 %vm474_vm0, %v433_v30  ;;  %1058 = vperm.xlu1 %1460, %v1048_v32   ;;  %v410_v0 = vld [vmem:[%s1672_s28 + $0x20] sm:$0xff]  ;;  %v425_v4 = vld [vmem:[%s1672_s28 + $0x98] sm:$0xff]  ;;  %v460_v7 = vld [vmem:[%s1667_s25 + $0x90] sm:$0xff] }
  0x2c   : > { %v445_v5 = vld [vmem:[%s1667_s25 + $0x18] sm:$0xff]  ;;  %v424_v8 = vld [vmem:[%s1672_s28 + $0x90] sm:$0xff]  ;;  %v459_v11 = vld [vmem:[%s1667_s25 + $0x88] sm:$0xff] }
  0x2d   : > { %1063 = vperm.xlu0 %1459, %v1049_v31   ;;  %1339 = vmatpush3.xpose.msk.msra.mxu0 %vm474_vm0, %v453_v33  ;;  %v409_v6 = vld [vmem:[%s1672_s28 + $0x18] sm:$0xff]  ;;  %v444_v9 = vld [vmem:[%s1667_s25 + $0x10] sm:$0xff]  ;;  %v423_v12 = vld [vmem:[%s1672_s28 + $0x88] sm:$0xff] }
  0x2e   : > { %1379 = vmatpush3.xpose.msk.msra.mxu1 %vm474_vm0, %v417_v34  ;;  %1340 = vmatprep.subr.msk.mxu0 %vm474_vm0, %v468_v35  ;;  %v408_v10 = vld [vmem:[%s1672_s28 + $0x10] sm:$0xff]  ;;  %v443_v13 = vld [vmem:[%s1667_s25 + $0x8] sm:$0xff]  ;;  %v458_v15 = vld [vmem:[%s1667_s25 + $0x80] sm:$0xff] }
  0x2f   : > { %1380 = vmatprep.subr.msk.mxu1 %vm474_vm0, %v432_v36  ;;  %1068 = vperm.xlu1 %1460, %v1050_v38   ;;  %v407_v14 = vld [vmem:[%s1672_s28 + $0x8] sm:$0xff]  ;;  %v422_v16 = vld [vmem:[%s1672_s28 + $0x80] sm:$0xff]  ;;  %v440_v21 = vld [vmem:[%s1934_s3 + $0x10] sm:$0xff] }
  0x30   : > { %v442_v17 = vld [vmem:[%s1667_s25] sm:$0xff]  ;;  %v439_v19 = vld [vmem:[%s1934_s3 + $0x8] sm:$0xff]  ;;  %v404_v22 = vld [vmem:[%s1933_s2 + $0x10] sm:$0xff] }
  0x31   : > { %1100 = vperm.xlu0 %1459, %v1097_v37   ;;  %1341 = vmatpush3.xpose.msk.msra.mxu0 %vm474_vm0, %v452_v39  ;;  %v406_v18 = vld [vmem:[%s1672_s28] sm:$0xff]  ;;  %v403_v20 = vld [vmem:[%s1933_s2 + $0x8] sm:$0xff] }
  0x32   : > { %1381 = vmatpush3.xpose.msk.msra.mxu1 %vm474_vm0, %v416_v40  ;;  %1342 = vmatprep.subr.msk.mxu0 %vm474_vm0, %v467_v41 }
  0x33   : > { %1382 = vmatprep.subr.msk.mxu1 %vm474_vm0, %v431_v42 }
  0x35   : > { %1343 = vmatpush3.xpose.msk.msra.mxu0 %vm474_vm0, %v451_v43 }
  0x36   : > { %1383 = vmatpush3.xpose.msk.msra.mxu1 %vm474_vm0, %v415_v44  ;;  %1344 = vmatprep.subr.msk.mxu0 %vm474_vm0, %v466_v45 }
  0x37   : > { %1384 = vmatprep.subr.msk.mxu1 %vm474_vm0, %v430_v46 }
  0x39   : > { %1345 = vmatpush3.xpose.msk.msra.mxu0 %vm474_vm0, %v450_v47 }
  0x3a   : > { %1385 = vmatpush3.xpose.msk.msra.mxu1 %vm474_vm0, %v414_v48  ;;  %1346 = vmatprep.subr.msk.mxu0 %vm474_vm0, %v465_v49 }
  0x3b   : > { %1386 = vmatprep.subr.msk.mxu1 %vm474_vm0, %v429_v50 }
  0x3d   : > { %1347 = vmatpush3.xpose.msk.msra.mxu0 %vm474_vm0, %v449_v51 }
  0x3e   : > { %1387 = vmatpush3.xpose.msk.msra.mxu1 %vm474_vm0, %v413_v52  ;;  %1348 = vmatprep.subr.msk.mxu0 %vm474_vm0, %v464_v53 }
  0x3f   : > { %1388 = vmatprep.subr.msk.mxu1 %vm474_vm0, %v428_v54 }
  0x41   : > { %1349 = vmatpush3.xpose.msk.msra.mxu0 %vm474_vm0, %v448_v55 }
  0x42   : > { %1389 = vmatpush3.xpose.msk.msra.mxu1 %vm474_vm0, %v412_v56  ;;  %1350 = vmatprep.subr.msk.mxu0 %vm474_vm0, %v463_v57 }
  0x43   : > { %1390 = vmatprep.subr.msk.mxu1 %vm474_vm0, %v427_v58 }
  0x45   : > { %1351 = vmatpush3.xpose.msk.msra.mxu0 %vm474_vm0, %v447_v59 }
  0x46   : > { %1391 = vmatpush3.xpose.msk.msra.mxu1 %vm474_vm0, %v411_v60  ;;  %1352 = vmatprep.subr.msk.mxu0 %vm474_vm0, %v462_v61 }
  0x47   : > { %1392 = vmatprep.subr.msk.mxu1 %vm474_vm0, %v426_v62 }
  0x49   : > { %1353 = vmatpush3.xpose.msk.msra.mxu0 %vm474_vm0, %v446_v63 }
  0x4a   : > { %1393 = vmatpush3.xpose.msk.msra.mxu1 %vm474_vm0, %v410_v0  ;;  %1354 = vmatprep.subr.msk.mxu0 %vm474_vm0, %v461_v3 }
  0x4b   : > { %1394 = vmatprep.subr.msk.mxu1 %vm474_vm0, %v425_v4 }
  0x4d   : > { %1355 = vmatpush3.xpose.msk.msra.mxu0 %vm474_vm0, %v445_v5 }
  0x4e   : > { %1395 = vmatpush3.xpose.msk.msra.mxu1 %vm474_vm0, %v409_v6  ;;  %1356 = vmatprep.subr.msk.mxu0 %vm474_vm0, %v460_v7  ;;  %v909_v6 = vld [vmem:[%s1936_s5] sm:$0xff]  ;;  %v911_v7 = vld [vmem:[%s1936_s5 + $0x10] sm:$0xff] }
  0x4f   : > { %1396 = vmatprep.subr.msk.mxu1 %vm474_vm0, %v424_v8  ;;  %v910_v8 = vld [vmem:[%s1936_s5 + $0x8] sm:$0xff] }
  0x51   : > { %1357 = vmatpush3.xpose.msk.msra.mxu0 %vm474_vm0, %v444_v9  ;;  %v912_v9 = vld [vmem:[%s1936_s5 + $0x18] sm:$0xff] }
  0x52   : > { %1397 = vmatpush3.xpose.msk.msra.mxu1 %vm474_vm0, %v408_v10  ;;  %1358 = vmatprep.subr.msk.mxu0 %vm474_vm0, %v459_v11 }
  0x53   : > { %1398 = vmatprep.subr.msk.mxu1 %vm474_vm0, %v423_v12 }
  0x55   : > { %1359 = vmatpush3.xpose.msk.msra.mxu0 %vm474_vm0, %v443_v13 }
  0x56   : > { %1399 = vmatpush3.xpose.msk.msra.mxu1 %vm474_vm0, %v407_v14  ;;  %1360 = vmatprep.subr.msk.mxu0 %vm474_vm0, %v458_v15 }
  0x57   : > { %1400 = vmatprep.subr.msk.mxu1 %vm474_vm0, %v422_v16 }
  0x59   : > { %1361 = vmatpush3.xpose.msk.msra.mxu0 %vm474_vm0, %v442_v17 }
  0x5a   : > { %1401 = vmatpush3.xpose.msk.msra.mxu1 %vm474_vm0, %v406_v18 }
  0x5c   : > { %1363 = vmatmul.mubr.msk.f32.vlgmr.msra.gmra.mxu0 %vm474_vm0, %v1642_v1  ;;  %v441_v1 = vld [vmem:[%s1934_s3 + $0x18] sm:$0xff] }
  0x5d   : > { %1403 = vmatmul.mubr.msk.f32.vlgmr.msra.gmra.mxu1 %vm474_vm0, %v1647_v2  ;;  %1364 = vmatprep.mubr.msk.f32.mxu0 %vm474_vm0, %v439_v19  ;;  %v405_v2 = vld [vmem:[%s1933_s2 + $0x18] sm:$0xff] }
  0x5e   : > { %1404 = vmatprep.mubr.msk.f32.mxu1 %vm474_vm0, %v403_v20 }
  0x60   : > { %1365 = vmatmul.mubr.msk.f32.gmra.mxu0 %vm474_vm0, %v439_v19 }
  0x61   : > { %1405 = vmatmul.mubr.msk.f32.gmra.mxu1 %vm474_vm0, %v403_v20  ;;  %1366 = vmatprep.mubr.msk.f32.mxu0 %vm474_vm0, %v440_v21 }
  0x62   : > { %1406 = vmatprep.mubr.msk.f32.mxu1 %vm474_vm0, %v404_v22 }
  0x64   : > { %1367 = vmatmul.mubr.msk.f32.gmra.mxu0 %vm474_vm0, %v440_v21 }
  0x65   : > { %1407 = vmatmul.mubr.msk.f32.gmra.mxu1 %vm474_vm0, %v404_v22  ;;  %1368 = vmatprep.mubr.msk.f32.mxu0 %vm474_vm0, %v441_v1 }
  0x66   : > { %1408 = vmatprep.mubr.msk.f32.mxu1 %vm474_vm0, %v405_v2 }
  0x68   : > { %1369 = vmatmul.mubr.msk.f32.gmra.mxu0 %vm474_vm0, %v441_v1 }
  0x69   : > { %1409 = vmatmul.mubr.msk.f32.gmra.mxu1 %vm474_vm0, %v405_v2  ;;  %1014 = vmatprep.mubr.f32.mxu0 %v1532_v23 }
  0x6a   : > { %1026 = vmatprep.mubr.f32.mxu1 %v1532_v23 }
  0x94   : > { %v891_v34 = vpop.permute.xlu0 %890  ;;  %v881_v39 = vpop.permute.xlu1 %880 }
  0x98   : > { %v886_v47 = vpop.permute.xlu0 %885 }
  0x9a   : > { %v876_v55 = vpop.permute.xlu1 %875 }
  0x9c   : > { %v920_v10 = vpop.permute.xlu0 %919 }
  0x9e   : > { %v925_v11 = vpop.permute.xlu1 %924 }
  0xa0   : > { %v930_v12 = vpop.permute.xlu0 %929 }
  0xa2   : > { %v935_v15 = vpop.permute.xlu1 %934 }
  0xa4   : > { %v1054_v1 = vpop.permute.xlu0 %1053 }
 0x11c   : > { %v649_v24 = vpop.f32.mrf.mxu0 }
 0x11d   : > { %v846_v25 = vpop.f32.mrf.mxu1 }
 0x11e   : > { %v651_v26 = vpop.f32.mrf.mxu0  ;;  %v847_v53 = vadd.f32 %v846_v25, %v649_v24 }
 0x11f   : > { %v848_v27 = vpop.f32.mrf.mxu1 }
 0x120   : > { %v655_v28 = vpop.f32.mrf.mxu0  ;;  %v849_v50 = vadd.f32 %v848_v27, %v651_v26  ;;  %v893_v62 = vadd.f32 %v876_v55, %v847_v53 }
 0x121   : > { %v852_v29 = vpop.f32.mrf.mxu1 }
 0x122   : > { %v657_v30 = vpop.f32.mrf.mxu0  ;;  %v853_v48 = vadd.f32 %v852_v29, %v655_v28  ;;  %v894_v60 = vadd.f32 %v876_v55, %v849_v50  ;;  %v901_v5 = vmax.f32 %v893_v62, 0.0  ;;  %v1059_v28 = vpop.permute.xlu1 %1058 }
 0x123   : > { %v854_v31 = vpop.f32.mrf.mxu1 }
 0x124   : > { %v661_v32 = vpop.f32.mrf.mxu0  ;;  %v855_v45 = vadd.f32 %v854_v31, %v657_v30  ;;  %v895_v58 = vadd.f32 %v881_v39, %v853_v48  ;;  %v902_v4 = vmax.f32 %v894_v60, 0.0 }
 0x125   : > { %v858_v33 = vpop.f32.mrf.mxu1 }
 0x126   : > { %v663_v35 = vpop.f32.mrf.mxu0  ;;  %v859_v42 = vadd.f32 %v858_v33, %v661_v32  ;;  %v896_v56 = vadd.f32 %v881_v39, %v855_v45  ;;  %v903_v3 = vmax.f32 %v895_v58, 0.0  ;;  %v1064_v39 = vpop.permute.xlu0 %1063 }
 0x127   : > { %v860_v36 = vpop.f32.mrf.mxu1  ;;  %v1069_v45 = vpop.permute.xlu1 %1068 }
 0x128   : > { %v667_v37 = vpop.f32.mrf.mxu0  ;;  %v861_v40 = vadd.f32 %v860_v36, %v663_v35  ;;  %v897_v54 = vadd.f32 %v886_v47, %v859_v42  ;;  %v904_v0 = vmax.f32 %v896_v56, 0.0 }
 0x129   : > { %v864_v38 = vpop.f32.mrf.mxu1 }
 0x12a   : > { %v865_v41 = vadd.f32 %v864_v38, %v667_v37  ;;  %v669_v43 = vpop.f32.mrf.mxu0  ;;  %v898_v51 = vadd.f32 %v886_v47, %v861_v40  ;;  %v905_v63 = vmax.f32 %v897_v54, 0.0 }
 0x12b   : > { %v866_v44 = vpop.f32.mrf.mxu1 }
 0x12c   : > { %v867_v46 = vadd.f32 %v866_v44, %v669_v43  ;;  %v899_v49 = vadd.f32 %v891_v34, %v865_v41  ;;  %v906_v61 = vmax.f32 %v898_v51, 0.0 }
 0x12e   : > { %v900_v52 = vadd.f32 %v891_v34, %v867_v46  ;;  %v907_v59 = vmax.f32 %v899_v49, 0.0 }
 0x130   : > { %v908_v57 = vmax.f32 %v900_v52, 0.0  ;;  %v1103_v52 = vlaneseq }
 0x132   : > { %974 = vmatprep.subr.mxu0 %v908_v57  ;;  %1410 = vmatprep.subr.mxu1 %v908_v57  ;;  %v1104_v57 = vshrl.u32 %v1103_v52, 7  ;;  %vm1141_vm2 = vcmp.lt.s32.totalorder %v1103_v52, 256 }
 0x133   : > { %975 = vmatpush1.msra.mxu0 %v907_v59  ;;  %1414 = vmatpush1.msra.mxu1 %v907_v59 }
 0x134   : > { %976 = vmatprep.subr.mxu0 %v906_v61  ;;  %1411 = vmatprep.subr.mxu1 %v906_v61  ;;  %v1105_v62 = vsub.s32 0, %v1104_v57 }
 0x135   : > { %977 = vmatpush1.msra.mxu0 %v905_v63  ;;  %1415 = vmatpush1.msra.mxu1 %v905_v63 }
 0x136   : > { %978 = vmatprep.subr.mxu0 %v904_v0  ;;  %1412 = vmatprep.subr.mxu1 %v904_v0  ;;  %v1101_v0 = vpop.permute.xlu0 %1100 }
 0x137   : > { %979 = vmatpush1.msra.mxu0 %v903_v3  ;;  %1416 = vmatpush1.msra.mxu1 %v903_v3 }
 0x138   : > { %980 = vmatprep.subr.mxu0 %v902_v4  ;;  %1413 = vmatprep.subr.mxu1 %v902_v4 }
 0x139   : > { %981 = vmatpush1.msra.mxu0 %v901_v5  ;;  %1417 = vmatpush1.msra.mxu1 %v901_v5 }
 0x13a   : > { %1316 = vmatmul.mubr.msk.f32.vlgmr.msra.gmra.mxu0 %vm937_vm1, %v909_v6  ;;  %1318 = vmatmul.mubr.msk.f32.vlgmr.msra.gmra.mxu1 %vm937_vm1, %v911_v7  ;;  %v1106_v6 = vrot.slane %v1101_v0, %v1105_v62 }
 0x13b   : > { %1020 = vmatprep.mubr.f32.mxu0 %v1532_v23  ;;  %1032 = vmatprep.mubr.f32.mxu1 %v1532_v23 }
 0x13e   : > { %1317 = vmatmul.mubr.msk.f32.gmra.mxu0 %vm937_vm1, %v910_v8  ;;  %1319 = vmatmul.mubr.msk.f32.gmra.mxu1 %vm937_vm1, %v912_v9 }
 0x1fa   : > { %v1016_v13 = vpop.f32.mrf.mxu0  ;;  %v1028_v14 = vpop.f32.mrf.mxu1 }
 0x1fb   : > { %v1017_v16 = vadd.f32 %v1016_v13, %v920_v10  ;;  %v1029_v20 = vadd.f32 %v1028_v14, %v930_v12 }
 0x1fc   : > { %v1018_v17 = vpop.f32.mrf.mxu0  ;;  %v1030_v18 = vpop.f32.mrf.mxu1 }
 0x1fd   : > { %v1019_v19 = vadd.f32 %v1018_v17, %v920_v10  ;;  %v1031_v2 = vadd.f32 %v1030_v18, %v930_v12  ;;  %v1039_v23 = vmax.f32 %v1017_v16, 0.0  ;;  %v1043_v32 = vmax.f32 %v1029_v20, 0.0 }
 0x1fe   : > { %v1022_v21 = vpop.f32.mrf.mxu0  ;;  %v1034_v22 = vpop.f32.mrf.mxu1  ;;  %v1533_v17 = vmov 1966171168  }
 0x1ff   : > { %v1023_v24 = vadd.f32 %v1022_v21, %v925_v11  ;;  %v1035_v25 = vadd.f32 %v1034_v22, %v935_v15  ;;  %v1040_v29 = vmax.f32 %v1019_v19, 0.0  ;;  %v1044_v34 = vmax.f32 %v1031_v2, 0.0 }
 0x200   : > { %v1024_v26 = vpop.f32.mrf.mxu0  ;;  %v1036_v27 = vpop.f32.mrf.mxu1  ;;  %v1071_v36 = vmul.f32 %v1054_v1, %v1039_v23  ;;  %v1075_v43 = vmul.f32 %v1064_v39, %v1043_v32  ;;  %v1125_v18 = vunpack.c.l.s4 %v1533_v17 }
 0x201   : > { %v1025_v30 = vadd.f32 %v1024_v26, %v925_v11  ;;  %v1037_v31 = vadd.f32 %v1036_v27, %v935_v15  ;;  %v1041_v33 = vmax.f32 %v1023_v24, 0.0  ;;  %v1045_v38 = vmax.f32 %v1035_v25, 0.0 }
 0x202   : > { %v1072_v40 = vmul.f32 %v1054_v1, %v1040_v29  ;;  %v1076_v46 = vmul.f32 %v1064_v39, %v1044_v34  ;;  %v1126_v19 = vunpack.c.0.s8 %v1125_v18 }
 0x203   : > { %v1042_v35 = vmax.f32 %v1025_v30, 0.0  ;;  %v1073_v37 = vmul.f32 %v1059_v28, %v1041_v33  ;;  %v1046_v42 = vmax.f32 %v1037_v31, 0.0  ;;  %v1077_v48 = vmul.f32 %v1069_v45, %v1045_v38 }
 0x204   : > { %v1129_v21 = vsub.s32 %v1126_v19, %v1104_v57 }
 0x205   : > { %v1074_v41 = vmul.f32 %v1059_v28, %v1042_v35  ;;  %v1079_v44 = vadd.f32 %v1073_v37, %v1071_v36  ;;  %v1078_v50 = vmul.f32 %v1069_v45, %v1046_v42 }
 0x207   : > { %v1088_v47 = vadd.f32 %v1074_v41, %v1072_v40  ;;  %v1080_v49 = vadd.f32 %v1079_v44, %v1075_v43 }
 0x209   : > { %v1089_v51 = vadd.f32 %v1088_v47, %v1076_v46  ;;  %v1081_v53 = vadd.f32 %v1080_v49, %v1077_v48 }
 0x20b   : > { %v1090_v54 = vadd.f32 %v1089_v51, %v1078_v50  ;;  %v1082_v55 = vrot.slane %v1081_v53, 4 }
 0x20d   : > { %v1091_v56 = vrot.slane %v1090_v54, 4  ;;  %v1083_v58 = vadd.f32 %v1082_v55, %v1081_v53 }
 0x20f   : > { %v1092_v59 = vadd.f32 %v1091_v56, %v1090_v54  ;;  %v1084_v60 = vrot.slane %v1083_v58, 2 }
 0x211   : > { %v1093_v61 = vrot.slane %v1092_v59, 2  ;;  %v1085_v63 = vadd.f32 %v1084_v60, %v1083_v58 }
 0x213   : > { %v1094_v3 = vadd.f32 %v1093_v61, %v1092_v59  ;;  %v1086_v4 = vrot.slane %v1085_v63, 1 }
 0x215   : > { %v1095_v5 = vrot.slane %v1094_v3, 1  ;;  %v1087_v7 = vadd.f32 %v1086_v4, %v1085_v63 }
 0x217   : > { %v1096_v8 = vadd.f32 %v1095_v5, %v1094_v3  ;;  %v1107_v9 = vadd.f32 %v1106_v6, %v1087_v7 }
 0x219   : > { %v1108_v10 = vadd.f32 %v1106_v6, %v1096_v8  ;;  %v1320_v11 = vmul.f32 -1.442695, %v1107_v9 }
 0x21b   : > { %v1321_v12 = vmul.f32 -1.442695, %v1108_v10  ;;  %1461 = vpow2.f32 %v1320_v11 }
 0x21d   : > { %1463 = vpow2.f32 %v1321_v12 }
 0x228   : > { %v1462_v13 = vpop.eup %1461 }
 0x229   : > { %v1115_v15 = vadd.f32 1.0, %v1462_v13 }
 0x22a   : > { %v1464_v14 = vpop.eup %1463 }
 0x22b   : > { %v1116_v16 = vadd.f32 1.0, %v1464_v14  ;;  %1465 = vrcp.f32 %v1115_v15 }
 0x22d   : > { %1467 = vrcp.f32 %v1116_v16 }
 0x238   : > { %v1466_v20 = vpop.eup %1465 }
 0x23a   : > { %v1468_v22 = vpop.eup %1467 }
 0x23b   : > { %v1123_v1 = vcombine.low %v1466_v20, %v1468_v22 }
 0x23d   : > { %v1130_v2 = vrot.slane %v1123_v1, %v1129_v21  ;;  %1151 = sbr.rel (!%p1626_p5) target bundleno = 604 (0x25c), region = 60 }
 0x23f   : > { %v1137_v23 = vrot.slane %v1130_v2, %v1129_v21 }
 0x241   : > { %1143 = vst.msk [vmem:[%s368_s23] sm:$0x3] %vm1141_vm2, %v1137_v23 }
 0x242   : > { %s1948_s27 = smov (!%p1154_p11, %s1153_s27), 2 }
 0x243   : > { %s1889_s30 = sshll.u32 %s1948_s27, 4 }
 0x244   : > { %s1158_s10 = ssub.s32 32, %s1889_s30 }
 0x245   : > { %1159 = vsyncadd %s1884_s24, %s1158_s10  ;;  %p1325_p12 = scmp.ne.s32.totalorder %s1889_s30, 0  ;;  %s1162_s20 = scalar_lea.hbm %s1940_s9, %s1637_s22 }
 0x246   : > { %s1164_s29 = sshll.u32 %s368_s23, 4  ;;  %s1534_s15 = smov [#allocation3]   ;;  %s1165_s29 = int_to_ptr.vmem [resolvable:$true] %s1164_s29 }
 0x247   : > { %s1469_s8 = scalar_lea.vmem %s1165_s29, %s1889_s30  ;;  %s1473_s17 = sshll.u32 %s1534_s15, 4  ;;  %s1474_s17 = int_to_ptr.vmem [resolvable:$false] %s1473_s17 }
 0x248   : > { %p1470_p13 = scmp.ne.s32.totalorder %s1165_s29, %s1469_s8  ;;  %s1475_s18 = scalar_lea.vmem %s1474_s17, 64 }
 0x249   : > { %p1476_p2 = scmp.lt.s32.totalorder %s1165_s29, %s1474_s17  ;;  %p1477_p3 = scmp.lt.s32.totalorder %s1475_s18, %s1469_s8 }
 0x24a   : > { %p1471_p0 = pnand %p1470_p13, %p1325_p12 }
 0x24b   : > { %p1478_p4 = por %p1477_p3, %p1476_p2 }
 0x24c   : > { %p1472_p1 = pneg %p1471_p0 }
 0x24e   : > { %p1479_p5 = pnand %p1478_p4, %p1472_p1 }
 0x250   : > { %1482 = shalt.err (!%p1479_p5)
}
 0x251   : > { %s1483_s26 = scalar_lea.hbm %s1162_s20, %s1889_s30  ;;  %s1487_s27 = scalar_lea.hbm %s1940_s9, 48 }
 0x252   : > { %p1484_p7 = scmp.ne.s32.totalorder %s1162_s20, %s1483_s26  ;;  %p1488_p10 = scmp.lt.s32.totalorder %s1162_s20, %s1940_s9 }
 0x253   : > { %p1489_p11 = scmp.lt.s32.totalorder %s1487_s27, %s1483_s26 }
 0x254   : > { %p1485_p8 = pnand %p1484_p7, %p1325_p12 }
 0x255   : > { %p1490_p13 = por %p1489_p11, %p1488_p10 }
 0x256   : > { %p1486_p9 = pneg %p1485_p8 }
 0x258   : > { %p1491_p0 = pnand %p1490_p13, %p1486_p9 }
 0x25a   : > { %1494 = shalt.err (!%p1491_p0)
}
 0x25b   : > { %1167 = dma.vmem_to_hbm [thread:$0]  (%p1325_p12), %s1165_s29, %s1889_s30, %s1162_s20, %s1884_s24  }
 0x25c PF: > { %p1423_p1 = scmp.ge.s32.totalorder %s1529_s14, 2  ;;  %s1176_s28 = sand.u32 1, %s1517_s11  }
 0x25d   : > { %s1177_s8 = scalar_lea.sflag [#allocation4], %s1176_s28 }
 0x25e   : > { %p1420_p2 = pnand %p1423_p1, %p1630_p6 }
 0x260   : > { %p1421_p3 = pneg %p1420_p2 }
 0x262   : > { %1512 = dma.done.wait (%p1421_p3), %s1177_s8, 32  }
 0x263   : > { %1514 = vsyncadd (%p1421_p3), %s1177_s8, 4294967264  ;;  %p21_p4 = scmp.ge.s32.totalorder %s1613_s16, 4   ;;  %s1943_s11 = smov %s1521_s12 }
 0x264   : > { %s1944_s12 = smov %s1525_s13  ;;  %s1945_s13 = smov %s1624_s19 }
 0x265   : > { %s1946_s14 = smov %s1613_s16  ;;  %23 = sbr.rel (!%p21_p4) target bundleno = 6 (0x6), region = 94 }
 0x26a   :  { %1182 = vsyncpa [#allocation4], 1 }
 0x26b   :  { %1184 = vsyncpa [#allocation4 + $0x1], 1 }

</bundles_post_ra>
